<compile_context>
chip_gen: v7x
topology: tpu7x:2x2x1
jax: 0.10.0
libtpu: 0.0.40
codegen_flags: <defaults>
</compile_context>

<pallas_src>
import functools

import jax
import jax.numpy as jnp
from jax.experimental import pallas as pl
from jax.experimental.pallas import tpu as pltpu

LANES = 128
NUM_HIDDEN = 20
PARAM_LEN = 64  # packed params: [w1(20), b1(20), w2(20), b2(1), pad...]


def fc_kernel(params_ref, x_ref, o_ref, *, compute_dtype):
    # params_ref: (64,) f32 in SMEM   -> scalar reads, broadcast into vregs
    # x_ref     : (br, 128) lane-dense tile of samples
    # o_ref     : (br, 128) lane-dense output tile
    #
    #   y = b2 + sum_j relu(x * w1[j] + b1[j]) * w2[j]
    #
    # Fully unrolled at trace time: pure VPU work, no MXU, no cross-lane
    # traffic.  With compute_dtype=bfloat16 each vreg packs [16,128] elements
    # (~2x VALU throughput on v6e/v7x); the result is cast back to o_ref.dtype.
    x = x_ref[...].astype(compute_dtype)

    # Start the accumulator at the fc2 bias (broadcast scalar).
    acc = jnp.full(x.shape, params_ref[3 * NUM_HIDDEN].astype(compute_dtype),
                   dtype=compute_dtype)

    for j in range(NUM_HIDDEN):
        w1j = params_ref[j].astype(compute_dtype)
        b1j = params_ref[NUM_HIDDEN + j].astype(compute_dtype)
        w2j = params_ref[2 * NUM_HIDDEN + j].astype(compute_dtype)
        h = jnp.maximum(x * w1j + b1j, 0)
        acc = acc + h * w2j
        # Note: folding w2j into layer 1 (saving one VALU op per hidden unit)
        # needs the *sign* of w2j at trace time; weights here are runtime
        # arrays, so that optimization is not applicable.

    o_ref[...] = acc.astype(o_ref.dtype)


def pack_params(w1, b1, w2, b2):
    """Pack the Linear(1,20)/Linear(20,1) params into one (64,) f32 array.

    Call once per weight update (hoisted out of the per-forward path)."""
    p = jnp.zeros((PARAM_LEN,), jnp.float32)
    p = p.at[0:NUM_HIDDEN].set(jnp.asarray(w1, jnp.float32).reshape(-1))
    p = p.at[NUM_HIDDEN:2 * NUM_HIDDEN].set(jnp.asarray(b1, jnp.float32).reshape(-1))
    p = p.at[2 * NUM_HIDDEN:3 * NUM_HIDDEN].set(jnp.asarray(w2, jnp.float32).reshape(-1))
    p = p.at[3 * NUM_HIDDEN].set(jnp.asarray(b2, jnp.float32).reshape(()))
    return p


def fc_forward(x, packed_params, *, block_rows=4096, compute_dtype=jnp.float32):
    """x: (N, 1) float32 (PyTorch layout).  Returns (N, 1)."""
    n = x.shape[0]
    dtype = x.dtype
    if n == 0:                                   # degenerate-batch guard
        return jnp.zeros((0, 1), dtype)

    x_flat = x.reshape(-1)

    # ---- lane-dense view -----------------------------------------------------
    rows = pl.cdiv(n, LANES)
    lane_pad = rows * LANES - n
    if lane_pad:
        # Only when N is not a multiple of 128: make the ragged (<128-elem)
        # tail row whole.  For lane-aligned N this pad and the matching output
        # slice below vanish entirely (pure reshapes around the kernel).
        x_flat = jnp.pad(x_flat, (0, lane_pad))
    x_slab = x_flat.reshape(rows, LANES)

    # ---- tile height ---------------------------------------------------------
    if rows <= 8:
        br = rows                                # single small tile
    else:
        br = min(block_rows, rows)
        if rows >= 16:
            # Keep >=2 grid steps so the "parallel" axis can split across both
            # v7x TensorCores (harmless on single-TC v5e/v6e).
            br = min(br, pl.cdiv(rows, 2))
        br = max(8, (br // 8) * 8)               # sublane multiple

    grid = (pl.cdiv(rows, br),)                  # partial last block is masked

    out_slab = pl.pallas_call(
        functools.partial(fc_kernel, compute_dtype=compute_dtype),
        out_shape=jax.ShapeDtypeStruct((rows, LANES), dtype),
        grid_spec=pltpu.PrefetchScalarGridSpec(
            num_scalar_prefetch=0,
            grid=grid,
            in_specs=[
                # packed params: whole array, lives in SMEM (scalar reads)
                pl.BlockSpec(memory_space=pltpu.MemorySpace.SMEM),
                # lane-dense input tile
                pl.BlockSpec((br, LANES), lambda i: (i, 0)),
            ],
            out_specs=pl.BlockSpec((br, LANES), lambda i: (i, 0)),
        ),
        compiler_params=pltpu.CompilerParams(
            dimension_semantics=("parallel",),
        ),
    )(packed_params, x_slab)

    out_flat = out_slab.reshape(-1)
    if lane_pad:
        out_flat = out_flat[:n]
    return out_flat.reshape(n, 1)


def init_params(key):
    """Deterministic init matching torch.nn.Linear's U(-1/sqrt(fan_in), +1/sqrt(fan_in))."""
    k1, k2, k3, k4 = jax.random.split(key, 4)
    bound1 = 1.0 / jnp.sqrt(1.0)   # fc1 fan_in = 1
    bound2 = 1.0 / jnp.sqrt(20.0)  # fc2 fan_in = 20
    w1 = jax.random.uniform(k1, (1, NUM_HIDDEN), jnp.float32, -bound1, bound1)
    b1 = jax.random.uniform(k2, (1, NUM_HIDDEN), jnp.float32, -bound1, bound1)
    w2 = jax.random.uniform(k3, (NUM_HIDDEN, 1), jnp.float32, -bound2, bound2)
    b2 = jax.random.uniform(k4, (1, 1), jnp.float32, -bound2, bound2)
    return w1, b1, w2, b2


def fc_reference(x, w1, b1, w2, b2):
    # Plain-JAX elementwise reference (avoids TPU reduced-precision matmul).
    h = jnp.maximum(x * w1.reshape(1, -1) + b1.reshape(1, -1), 0.0)
    return jnp.sum(h * w2.reshape(1, -1), axis=1, keepdims=True) + b2.reshape(1, 1)


if __name__ == "__main__":
    key = jax.random.PRNGKey(0)
    w1, b1, w2, b2 = init_params(key)

    # Parameter packing hoisted out of the per-forward path: pack once.
    params = pack_params(w1, b1, w2, b2)

    # Same as the PyTorch script: x = torch.linspace(-1, 1, 1000).unsqueeze(-1)
    N = 1000
    x = jnp.linspace(-1.0, 1.0, N, dtype=jnp.float32)[:, None]

    fwd = jax.jit(functools.partial(fc_forward, block_rows=4096))
    out = jax.block_until_ready(fwd(x, params))

    ref = fc_reference(x, w1, b1, w2, b2)
    assert out.shape == (N, 1)
    assert jnp.allclose(out, ref, atol=1e-5, rtol=1e-5)

    # Lane-aligned, multi-tile size: no pad / no slice in the wrapper and a
    # 2-step "parallel" grid (exercises the v7x dual-TensorCore split).
    N2 = 256 * LANES  # 32768 samples -> rows=256, br=128, grid=(2,)
    x2 = jnp.linspace(-1.0, 1.0, N2, dtype=jnp.float32)[:, None]
    out2 = jax.block_until_ready(fwd(x2, params))
    ref2 = fc_reference(x2, w1, b1, w2, b2)
    assert out2.shape == (N2, 1)
    assert jnp.allclose(out2, ref2, atol=1e-5, rtol=1e-5)

    # Optional bf16 compute path (~2x VPU throughput on v6e/v7x).  Output dtype
    # stays f32; expect ~1e-2-level error vs the f32 reference.
    fwd_bf16 = jax.jit(functools.partial(
        fc_forward, block_rows=4096, compute_dtype=jnp.bfloat16))
    out_bf16 = jax.block_until_ready(fwd_bf16(x2, params))
    assert out_bf16.shape == (N2, 1)
    assert float(jnp.max(jnp.abs(out_bf16 - ref2))) < 0.3

    print("KERNEL_OK")
</pallas_src>

<mosaic_0001>
module attributes {stable_mosaic.version = 11 : i64} {
  func.func @fc_kernel(%arg0: i32, %arg1: memref<64xf32, #tpu.memory_space<smem>>, %arg2: memref<8x128xf32, #tpu.memory_space<vmem>>, %arg3: memref<8x128xf32, #tpu.memory_space<vmem>>) attributes {dimension_semantics = [#tpu.dimension_semantics<parallel>], iteration_bounds = array<i64: 1>, scalar_prefetch = 0 : i64, scratch_operands = 0 : i64, tpu.core_type = #tpu.core_type<tc>, window_params = [{transform_indices = @transform_0, window_bounds = array<i64: 64>}, {transform_indices = @transform_1, window_bounds = array<i64: 8, 128>}, {transform_indices = @transform_2, window_bounds = array<i64: 8, 128>}]} {
    %c0 = arith.constant 0 : index
    %c0_0 = arith.constant 0 : index
    %0 = vector.load %arg2[%c0, %c0_0] : memref<8x128xf32, #tpu.memory_space<vmem>>, vector<8x128xf32>
    %c60 = arith.constant 60 : index
    %1 = memref.load %arg1[%c60] : memref<64xf32, #tpu.memory_space<smem>>
    %2 = vector.broadcast %1 : f32 to vector<8x128xf32>
    %c0_1 = arith.constant 0 : index
    %3 = memref.load %arg1[%c0_1] : memref<64xf32, #tpu.memory_space<smem>>
    %c20 = arith.constant 20 : index
    %4 = memref.load %arg1[%c20] : memref<64xf32, #tpu.memory_space<smem>>
    %c40 = arith.constant 40 : index
    %5 = memref.load %arg1[%c40] : memref<64xf32, #tpu.memory_space<smem>>
    %6 = vector.broadcast %3 : f32 to vector<8x128xf32>
    %7 = arith.mulf %0, %6 : vector<8x128xf32>
    %8 = vector.broadcast %4 : f32 to vector<8x128xf32>
    %9 = arith.addf %7, %8 : vector<8x128xf32>
    %cst = arith.constant 0.000000e+00 : f32
    %10 = vector.broadcast %cst : f32 to vector<8x128xf32>
    %11 = arith.maximumf %9, %10 : vector<8x128xf32>
    %12 = vector.broadcast %5 : f32 to vector<8x128xf32>
    %13 = arith.mulf %11, %12 : vector<8x128xf32>
    %14 = arith.addf %2, %13 : vector<8x128xf32>
    %c1 = arith.constant 1 : index
    %15 = memref.load %arg1[%c1] : memref<64xf32, #tpu.memory_space<smem>>
    %c21 = arith.constant 21 : index
    %16 = memref.load %arg1[%c21] : memref<64xf32, #tpu.memory_space<smem>>
    %c41 = arith.constant 41 : index
    %17 = memref.load %arg1[%c41] : memref<64xf32, #tpu.memory_space<smem>>
    %18 = vector.broadcast %15 : f32 to vector<8x128xf32>
    %19 = arith.mulf %0, %18 : vector<8x128xf32>
    %20 = vector.broadcast %16 : f32 to vector<8x128xf32>
    %21 = arith.addf %19, %20 : vector<8x128xf32>
    %cst_2 = arith.constant 0.000000e+00 : f32
    %22 = vector.broadcast %cst_2 : f32 to vector<8x128xf32>
    %23 = arith.maximumf %21, %22 : vector<8x128xf32>
    %24 = vector.broadcast %17 : f32 to vector<8x128xf32>
    %25 = arith.mulf %23, %24 : vector<8x128xf32>
    %26 = arith.addf %14, %25 : vector<8x128xf32>
    %c2 = arith.constant 2 : index
    %27 = memref.load %arg1[%c2] : memref<64xf32, #tpu.memory_space<smem>>
    %c22 = arith.constant 22 : index
    %28 = memref.load %arg1[%c22] : memref<64xf32, #tpu.memory_space<smem>>
    %c42 = arith.constant 42 : index
    %29 = memref.load %arg1[%c42] : memref<64xf32, #tpu.memory_space<smem>>
    %30 = vector.broadcast %27 : f32 to vector<8x128xf32>
    %31 = arith.mulf %0, %30 : vector<8x128xf32>
    %32 = vector.broadcast %28 : f32 to vector<8x128xf32>
    %33 = arith.addf %31, %32 : vector<8x128xf32>
    %cst_3 = arith.constant 0.000000e+00 : f32
    %34 = vector.broadcast %cst_3 : f32 to vector<8x128xf32>
    %35 = arith.maximumf %33, %34 : vector<8x128xf32>
    %36 = vector.broadcast %29 : f32 to vector<8x128xf32>
    %37 = arith.mulf %35, %36 : vector<8x128xf32>
    %38 = arith.addf %26, %37 : vector<8x128xf32>
    %c3 = arith.constant 3 : index
    %39 = memref.load %arg1[%c3] : memref<64xf32, #tpu.memory_space<smem>>
    %c23 = arith.constant 23 : index
    %40 = memref.load %arg1[%c23] : memref<64xf32, #tpu.memory_space<smem>>
    %c43 = arith.constant 43 : index
    %41 = memref.load %arg1[%c43] : memref<64xf32, #tpu.memory_space<smem>>
    %42 = vector.broadcast %39 : f32 to vector<8x128xf32>
    %43 = arith.mulf %0, %42 : vector<8x128xf32>
    %44 = vector.broadcast %40 : f32 to vector<8x128xf32>
    %45 = arith.addf %43, %44 : vector<8x128xf32>
    %cst_4 = arith.constant 0.000000e+00 : f32
    %46 = vector.broadcast %cst_4 : f32 to vector<8x128xf32>
    %47 = arith.maximumf %45, %46 : vector<8x128xf32>
    %48 = vector.broadcast %41 : f32 to vector<8x128xf32>
    %49 = arith.mulf %47, %48 : vector<8x128xf32>
    %50 = arith.addf %38, %49 : vector<8x128xf32>
    %c4 = arith.constant 4 : index
    %51 = memref.load %arg1[%c4] : memref<64xf32, #tpu.memory_space<smem>>
    %c24 = arith.constant 24 : index
    %52 = memref.load %arg1[%c24] : memref<64xf32, #tpu.memory_space<smem>>
    %c44 = arith.constant 44 : index
    %53 = memref.load %arg1[%c44] : memref<64xf32, #tpu.memory_space<smem>>
    %54 = vector.broadcast %51 : f32 to vector<8x128xf32>
    %55 = arith.mulf %0, %54 : vector<8x128xf32>
    %56 = vector.broadcast %52 : f32 to vector<8x128xf32>
    %57 = arith.addf %55, %56 : vector<8x128xf32>
    %cst_5 = arith.constant 0.000000e+00 : f32
    %58 = vector.broadcast %cst_5 : f32 to vector<8x128xf32>
    %59 = arith.maximumf %57, %58 : vector<8x128xf32>
    %60 = vector.broadcast %53 : f32 to vector<8x128xf32>
    %61 = arith.mulf %59, %60 : vector<8x128xf32>
    %62 = arith.addf %50, %61 : vector<8x128xf32>
    %c5 = arith.constant 5 : index
    %63 = memref.load %arg1[%c5] : memref<64xf32, #tpu.memory_space<smem>>
    %c25 = arith.constant 25 : index
    %64 = memref.load %arg1[%c25] : memref<64xf32, #tpu.memory_space<smem>>
    %c45 = arith.constant 45 : index
    %65 = memref.load %arg1[%c45] : memref<64xf32, #tpu.memory_space<smem>>
    %66 = vector.broadcast %63 : f32 to vector<8x128xf32>
    %67 = arith.mulf %0, %66 : vector<8x128xf32>
    %68 = vector.broadcast %64 : f32 to vector<8x128xf32>
    %69 = arith.addf %67, %68 : vector<8x128xf32>
    %cst_6 = arith.constant 0.000000e+00 : f32
    %70 = vector.broadcast %cst_6 : f32 to vector<8x128xf32>
    %71 = arith.maximumf %69, %70 : vector<8x128xf32>
    %72 = vector.broadcast %65 : f32 to vector<8x128xf32>
    %73 = arith.mulf %71, %72 : vector<8x128xf32>
    %74 = arith.addf %62, %73 : vector<8x128xf32>
    %c6 = arith.constant 6 : index
    %75 = memref.load %arg1[%c6] : memref<64xf32, #tpu.memory_space<smem>>
    %c26 = arith.constant 26 : index
    %76 = memref.load %arg1[%c26] : memref<64xf32, #tpu.memory_space<smem>>
    %c46 = arith.constant 46 : index
    %77 = memref.load %arg1[%c46] : memref<64xf32, #tpu.memory_space<smem>>
    %78 = vector.broadcast %75 : f32 to vector<8x128xf32>
    %79 = arith.mulf %0, %78 : vector<8x128xf32>
    %80 = vector.broadcast %76 : f32 to vector<8x128xf32>
    %81 = arith.addf %79, %80 : vector<8x128xf32>
    %cst_7 = arith.constant 0.000000e+00 : f32
    %82 = vector.broadcast %cst_7 : f32 to vector<8x128xf32>
    %83 = arith.maximumf %81, %82 : vector<8x128xf32>
    %84 = vector.broadcast %77 : f32 to vector<8x128xf32>
    %85 = arith.mulf %83, %84 : vector<8x128xf32>
    %86 = arith.addf %74, %85 : vector<8x128xf32>
    %c7 = arith.constant 7 : index
    %87 = memref.load %arg1[%c7] : memref<64xf32, #tpu.memory_space<smem>>
    %c27 = arith.constant 27 : index
    %88 = memref.load %arg1[%c27] : memref<64xf32, #tpu.memory_space<smem>>
    %c47 = arith.constant 47 : index
    %89 = memref.load %arg1[%c47] : memref<64xf32, #tpu.memory_space<smem>>
    %90 = vector.broadcast %87 : f32 to vector<8x128xf32>
    %91 = arith.mulf %0, %90 : vector<8x128xf32>
    %92 = vector.broadcast %88 : f32 to vector<8x128xf32>
    %93 = arith.addf %91, %92 : vector<8x128xf32>
    %cst_8 = arith.constant 0.000000e+00 : f32
    %94 = vector.broadcast %cst_8 : f32 to vector<8x128xf32>
    %95 = arith.maximumf %93, %94 : vector<8x128xf32>
    %96 = vector.broadcast %89 : f32 to vector<8x128xf32>
    %97 = arith.mulf %95, %96 : vector<8x128xf32>
    %98 = arith.addf %86, %97 : vector<8x128xf32>
    %c8 = arith.constant 8 : index
    %99 = memref.load %arg1[%c8] : memref<64xf32, #tpu.memory_space<smem>>
    %c28 = arith.constant 28 : index
    %100 = memref.load %arg1[%c28] : memref<64xf32, #tpu.memory_space<smem>>
    %c48 = arith.constant 48 : index
    %101 = memref.load %arg1[%c48] : memref<64xf32, #tpu.memory_space<smem>>
    %102 = vector.broadcast %99 : f32 to vector<8x128xf32>
    %103 = arith.mulf %0, %102 : vector<8x128xf32>
    %104 = vector.broadcast %100 : f32 to vector<8x128xf32>
    %105 = arith.addf %103, %104 : vector<8x128xf32>
    %cst_9 = arith.constant 0.000000e+00 : f32
    %106 = vector.broadcast %cst_9 : f32 to vector<8x128xf32>
    %107 = arith.maximumf %105, %106 : vector<8x128xf32>
    %108 = vector.broadcast %101 : f32 to vector<8x128xf32>
    %109 = arith.mulf %107, %108 : vector<8x128xf32>
    %110 = arith.addf %98, %109 : vector<8x128xf32>
    %c9 = arith.constant 9 : index
    %111 = memref.load %arg1[%c9] : memref<64xf32, #tpu.memory_space<smem>>
    %c29 = arith.constant 29 : index
    %112 = memref.load %arg1[%c29] : memref<64xf32, #tpu.memory_space<smem>>
    %c49 = arith.constant 49 : index
    %113 = memref.load %arg1[%c49] : memref<64xf32, #tpu.memory_space<smem>>
    %114 = vector.broadcast %111 : f32 to vector<8x128xf32>
    %115 = arith.mulf %0, %114 : vector<8x128xf32>
    %116 = vector.broadcast %112 : f32 to vector<8x128xf32>
    %117 = arith.addf %115, %116 : vector<8x128xf32>
    %cst_10 = arith.constant 0.000000e+00 : f32
    %118 = vector.broadcast %cst_10 : f32 to vector<8x128xf32>
    %119 = arith.maximumf %117, %118 : vector<8x128xf32>
    %120 = vector.broadcast %113 : f32 to vector<8x128xf32>
    %121 = arith.mulf %119, %120 : vector<8x128xf32>
    %122 = arith.addf %110, %121 : vector<8x128xf32>
    %c10 = arith.constant 10 : index
    %123 = memref.load %arg1[%c10] : memref<64xf32, #tpu.memory_space<smem>>
    %c30 = arith.constant 30 : index
    %124 = memref.load %arg1[%c30] : memref<64xf32, #tpu.memory_space<smem>>
    %c50 = arith.constant 50 : index
    %125 = memref.load %arg1[%c50] : memref<64xf32, #tpu.memory_space<smem>>
    %126 = vector.broadcast %123 : f32 to vector<8x128xf32>
    %127 = arith.mulf %0, %126 : vector<8x128xf32>
    %128 = vector.broadcast %124 : f32 to vector<8x128xf32>
    %129 = arith.addf %127, %128 : vector<8x128xf32>
    %cst_11 = arith.constant 0.000000e+00 : f32
    %130 = vector.broadcast %cst_11 : f32 to vector<8x128xf32>
    %131 = arith.maximumf %129, %130 : vector<8x128xf32>
    %132 = vector.broadcast %125 : f32 to vector<8x128xf32>
    %133 = arith.mulf %131, %132 : vector<8x128xf32>
    %134 = arith.addf %122, %133 : vector<8x128xf32>
    %c11 = arith.constant 11 : index
    %135 = memref.load %arg1[%c11] : memref<64xf32, #tpu.memory_space<smem>>
    %c31 = arith.constant 31 : index
    %136 = memref.load %arg1[%c31] : memref<64xf32, #tpu.memory_space<smem>>
    %c51 = arith.constant 51 : index
    %137 = memref.load %arg1[%c51] : memref<64xf32, #tpu.memory_space<smem>>
    %138 = vector.broadcast %135 : f32 to vector<8x128xf32>
    %139 = arith.mulf %0, %138 : vector<8x128xf32>
    %140 = vector.broadcast %136 : f32 to vector<8x128xf32>
    %141 = arith.addf %139, %140 : vector<8x128xf32>
    %cst_12 = arith.constant 0.000000e+00 : f32
    %142 = vector.broadcast %cst_12 : f32 to vector<8x128xf32>
    %143 = arith.maximumf %141, %142 : vector<8x128xf32>
    %144 = vector.broadcast %137 : f32 to vector<8x128xf32>
    %145 = arith.mulf %143, %144 : vector<8x128xf32>
    %146 = arith.addf %134, %145 : vector<8x128xf32>
    %c12 = arith.constant 12 : index
    %147 = memref.load %arg1[%c12] : memref<64xf32, #tpu.memory_space<smem>>
    %c32 = arith.constant 32 : index
    %148 = memref.load %arg1[%c32] : memref<64xf32, #tpu.memory_space<smem>>
    %c52 = arith.constant 52 : index
    %149 = memref.load %arg1[%c52] : memref<64xf32, #tpu.memory_space<smem>>
    %150 = vector.broadcast %147 : f32 to vector<8x128xf32>
    %151 = arith.mulf %0, %150 : vector<8x128xf32>
    %152 = vector.broadcast %148 : f32 to vector<8x128xf32>
    %153 = arith.addf %151, %152 : vector<8x128xf32>
    %cst_13 = arith.constant 0.000000e+00 : f32
    %154 = vector.broadcast %cst_13 : f32 to vector<8x128xf32>
    %155 = arith.maximumf %153, %154 : vector<8x128xf32>
    %156 = vector.broadcast %149 : f32 to vector<8x128xf32>
    %157 = arith.mulf %155, %156 : vector<8x128xf32>
    %158 = arith.addf %146, %157 : vector<8x128xf32>
    %c13 = arith.constant 13 : index
    %159 = memref.load %arg1[%c13] : memref<64xf32, #tpu.memory_space<smem>>
    %c33 = arith.constant 33 : index
    %160 = memref.load %arg1[%c33] : memref<64xf32, #tpu.memory_space<smem>>
    %c53 = arith.constant 53 : index
    %161 = memref.load %arg1[%c53] : memref<64xf32, #tpu.memory_space<smem>>
    %162 = vector.broadcast %159 : f32 to vector<8x128xf32>
    %163 = arith.mulf %0, %162 : vector<8x128xf32>
    %164 = vector.broadcast %160 : f32 to vector<8x128xf32>
    %165 = arith.addf %163, %164 : vector<8x128xf32>
    %cst_14 = arith.constant 0.000000e+00 : f32
    %166 = vector.broadcast %cst_14 : f32 to vector<8x128xf32>
    %167 = arith.maximumf %165, %166 : vector<8x128xf32>
    %168 = vector.broadcast %161 : f32 to vector<8x128xf32>
    %169 = arith.mulf %167, %168 : vector<8x128xf32>
    %170 = arith.addf %158, %169 : vector<8x128xf32>
    %c14 = arith.constant 14 : index
    %171 = memref.load %arg1[%c14] : memref<64xf32, #tpu.memory_space<smem>>
    %c34 = arith.constant 34 : index
    %172 = memref.load %arg1[%c34] : memref<64xf32, #tpu.memory_space<smem>>
    %c54 = arith.constant 54 : index
    %173 = memref.load %arg1[%c54] : memref<64xf32, #tpu.memory_space<smem>>
    %174 = vector.broadcast %171 : f32 to vector<8x128xf32>
    %175 = arith.mulf %0, %174 : vector<8x128xf32>
    %176 = vector.broadcast %172 : f32 to vector<8x128xf32>
    %177 = arith.addf %175, %176 : vector<8x128xf32>
    %cst_15 = arith.constant 0.000000e+00 : f32
    %178 = vector.broadcast %cst_15 : f32 to vector<8x128xf32>
    %179 = arith.maximumf %177, %178 : vector<8x128xf32>
    %180 = vector.broadcast %173 : f32 to vector<8x128xf32>
    %181 = arith.mulf %179, %180 : vector<8x128xf32>
    %182 = arith.addf %170, %181 : vector<8x128xf32>
    %c15 = arith.constant 15 : index
    %183 = memref.load %arg1[%c15] : memref<64xf32, #tpu.memory_space<smem>>
    %c35 = arith.constant 35 : index
    %184 = memref.load %arg1[%c35] : memref<64xf32, #tpu.memory_space<smem>>
    %c55 = arith.constant 55 : index
    %185 = memref.load %arg1[%c55] : memref<64xf32, #tpu.memory_space<smem>>
    %186 = vector.broadcast %183 : f32 to vector<8x128xf32>
    %187 = arith.mulf %0, %186 : vector<8x128xf32>
    %188 = vector.broadcast %184 : f32 to vector<8x128xf32>
    %189 = arith.addf %187, %188 : vector<8x128xf32>
    %cst_16 = arith.constant 0.000000e+00 : f32
    %190 = vector.broadcast %cst_16 : f32 to vector<8x128xf32>
    %191 = arith.maximumf %189, %190 : vector<8x128xf32>
    %192 = vector.broadcast %185 : f32 to vector<8x128xf32>
    %193 = arith.mulf %191, %192 : vector<8x128xf32>
    %194 = arith.addf %182, %193 : vector<8x128xf32>
    %c16 = arith.constant 16 : index
    %195 = memref.load %arg1[%c16] : memref<64xf32, #tpu.memory_space<smem>>
    %c36 = arith.constant 36 : index
    %196 = memref.load %arg1[%c36] : memref<64xf32, #tpu.memory_space<smem>>
    %c56 = arith.constant 56 : index
    %197 = memref.load %arg1[%c56] : memref<64xf32, #tpu.memory_space<smem>>
    %198 = vector.broadcast %195 : f32 to vector<8x128xf32>
    %199 = arith.mulf %0, %198 : vector<8x128xf32>
    %200 = vector.broadcast %196 : f32 to vector<8x128xf32>
    %201 = arith.addf %199, %200 : vector<8x128xf32>
    %cst_17 = arith.constant 0.000000e+00 : f32
    %202 = vector.broadcast %cst_17 : f32 to vector<8x128xf32>
    %203 = arith.maximumf %201, %202 : vector<8x128xf32>
    %204 = vector.broadcast %197 : f32 to vector<8x128xf32>
    %205 = arith.mulf %203, %204 : vector<8x128xf32>
    %206 = arith.addf %194, %205 : vector<8x128xf32>
    %c17 = arith.constant 17 : index
    %207 = memref.load %arg1[%c17] : memref<64xf32, #tpu.memory_space<smem>>
    %c37 = arith.constant 37 : index
    %208 = memref.load %arg1[%c37] : memref<64xf32, #tpu.memory_space<smem>>
    %c57 = arith.constant 57 : index
    %209 = memref.load %arg1[%c57] : memref<64xf32, #tpu.memory_space<smem>>
    %210 = vector.broadcast %207 : f32 to vector<8x128xf32>
    %211 = arith.mulf %0, %210 : vector<8x128xf32>
    %212 = vector.broadcast %208 : f32 to vector<8x128xf32>
    %213 = arith.addf %211, %212 : vector<8x128xf32>
    %cst_18 = arith.constant 0.000000e+00 : f32
    %214 = vector.broadcast %cst_18 : f32 to vector<8x128xf32>
    %215 = arith.maximumf %213, %214 : vector<8x128xf32>
    %216 = vector.broadcast %209 : f32 to vector<8x128xf32>
    %217 = arith.mulf %215, %216 : vector<8x128xf32>
    %218 = arith.addf %206, %217 : vector<8x128xf32>
    %c18 = arith.constant 18 : index
    %219 = memref.load %arg1[%c18] : memref<64xf32, #tpu.memory_space<smem>>
    %c38 = arith.constant 38 : index
    %220 = memref.load %arg1[%c38] : memref<64xf32, #tpu.memory_space<smem>>
    %c58 = arith.constant 58 : index
    %221 = memref.load %arg1[%c58] : memref<64xf32, #tpu.memory_space<smem>>
    %222 = vector.broadcast %219 : f32 to vector<8x128xf32>
    %223 = arith.mulf %0, %222 : vector<8x128xf32>
    %224 = vector.broadcast %220 : f32 to vector<8x128xf32>
    %225 = arith.addf %223, %224 : vector<8x128xf32>
    %cst_19 = arith.constant 0.000000e+00 : f32
    %226 = vector.broadcast %cst_19 : f32 to vector<8x128xf32>
    %227 = arith.maximumf %225, %226 : vector<8x128xf32>
    %228 = vector.broadcast %221 : f32 to vector<8x128xf32>
    %229 = arith.mulf %227, %228 : vector<8x128xf32>
    %230 = arith.addf %218, %229 : vector<8x128xf32>
    %c19 = arith.constant 19 : index
    %231 = memref.load %arg1[%c19] : memref<64xf32, #tpu.memory_space<smem>>
    %c39 = arith.constant 39 : index
    %232 = memref.load %arg1[%c39] : memref<64xf32, #tpu.memory_space<smem>>
    %c59 = arith.constant 59 : index
    %233 = memref.load %arg1[%c59] : memref<64xf32, #tpu.memory_space<smem>>
    %234 = vector.broadcast %231 : f32 to vector<8x128xf32>
    %235 = arith.mulf %0, %234 : vector<8x128xf32>
    %236 = vector.broadcast %232 : f32 to vector<8x128xf32>
    %237 = arith.addf %235, %236 : vector<8x128xf32>
    %cst_20 = arith.constant 0.000000e+00 : f32
    %238 = vector.broadcast %cst_20 : f32 to vector<8x128xf32>
    %239 = arith.maximumf %237, %238 : vector<8x128xf32>
    %240 = vector.broadcast %233 : f32 to vector<8x128xf32>
    %241 = arith.mulf %239, %240 : vector<8x128xf32>
    %242 = arith.addf %230, %241 : vector<8x128xf32>
    %c0_21 = arith.constant 0 : index
    %c0_22 = arith.constant 0 : index
    %243 = vector.load %arg3[%c0_21, %c0_22] : memref<8x128xf32, #tpu.memory_space<vmem>>, vector<8x128xf32>
    tpu.vector_store %arg3[%c0_21, %c0_22], %242 {strides = array<i32>} : memref<8x128xf32, #tpu.memory_space<vmem>>, vector<8x128xf32>,
    return
  }
  func.func @transform_0(%arg0: i32) -> i32 {
    %c0_i32 = arith.constant 0 : i32
    %c0_i32_0 = arith.constant 0 : i32
    return %c0_i32 : i32
  }
  func.func @transform_1(%arg0: i32) -> (i32, i32) {
    %c0_i32 = arith.constant 0 : i32
    %c0_i32_0 = arith.constant 0 : i32
    return %arg0, %c0_i32 : i32, i32
  }
  func.func @transform_2(%arg0: i32) -> (i32, i32) {
    %c0_i32 = arith.constant 0 : i32
    %c0_i32_0 = arith.constant 0 : i32
    return %arg0, %c0_i32 : i32, i32
  }
}

</mosaic_0001>

<bundles_post_ra>
// kernel: fc_forward.1
= control target key start
LH: loop header
LB: loop body
LE: loop exit
PB: predicated region body
PF: predicated region fallthrough
CT: control target
= control target key end

     0   :  { %7 = vsyncpa [#allocation4], 0  ;;  %s592_s0 = inlined_call_operand.vmem [shape: f32[64], index: 0, kind: input, shape index: {}]   ;;  %s593_s1 = inlined_call_operand.vmem [shape: f32[8,128], index: 1, kind: input, shape index: {}]   ;;  %s594_s2 = inlined_call_operand.hbm [shape: f32[8,128], index: 2, kind: output, shape index: {}]  }
   0x1   :  { %8 = vsyncpa [#allocation3], 0  ;;  %s15_s11 = sshll.u32 %s592_s0, 4  ;;  %s16_s11 = int_to_ptr.vmem [resolvable:$true] %s15_s11 }
   0x2   :  { %s326_s12 = scalar_lea.vmem %s16_s11, 16  ;;  %p331_p1 = scmp.lt.s32.totalorder %s16_s11, %s16_s11 }
   0x3   :  { %p327_p0 = scmp.ne.s32.totalorder %s16_s11, %s326_s12  ;;  %p332_p2 = scmp.lt.s32.totalorder %s326_s12, %s326_s12 }
   0x5   :  { %p333_p3 = por %p332_p2, %p331_p1 }
   0x7   :  { %p334_p4 = pnand %p333_p3, %p327_p0 }
   0x9   :  { %337 = shalt.err (!%p334_p4)
}
   0xa   :  { %s364_s13 = smov [#allocation2]  }
   0xb   :  { %18 = dma.vmem_to_smem %s16_s11, 16, %s364_s13, [#allocation4]  }
   0xc   :  { %360 = dma.done.wait [#allocation4], 16  }
   0xd   :  { %361 = vsyncadd [#allocation4], 4294967280 }
   0xe   :  { %24 = sfence }
   0xf   :  { %s384_s14 = sld [smem:[#allocation2 + $0x3c]]  ;;  %s28_s15 = sld [smem:[#allocation2]]  ;;  %v395_v0 = vld [vmem:[%s593_s1] sm:$0xff] }
  0x10   :  { %s265_s16 = sld [smem:[#allocation2 + $0x14]]  ;;  %s386_s17 = sld [smem:[#allocation2 + $0x28]] }
  0x11   :  { %s267_s0 = sld [smem:[#allocation2 + $0x1]]  ;;  %s388_s18 = sld [smem:[#allocation2 + $0x15]] }
  0x12   :  { %s390_s19 = sld [smem:[#allocation2 + $0x29]]  ;;  %s270_s20 = sld [smem:[#allocation2 + $0x2]] }
  0x13   :  { %s397_s23 = sld [smem:[#allocation2 + $0x16]]  ;;  %s399_s24 = sld [smem:[#allocation2 + $0x2a]] }
  0x14   :  { %s401_s25 = sld [smem:[#allocation2 + $0x3]]  ;;  %s403_s26 = sld [smem:[#allocation2 + $0x17]] }
  0x15   :  { %v31_v1 = vstv %s28_s15  ;;  %s405_s27 = sld [smem:[#allocation2 + $0x2b]]  ;;  %s407_s28 = sld [smem:[#allocation2 + $0x4]]  ;;  %v27_v6 = vstv %s384_s14 }
  0x16   :  { %v32_v2 = vmul.f32 %v31_v1, %v395_v0  ;;  %v33_v3 = vstv %s265_s16  ;;  %s410_s1 = sld [smem:[#allocation2 + $0x18]]  ;;  %s412_s29 = sld [smem:[#allocation2 + $0x2c]]  ;;  %v36_v10 = vstv %s386_s17 }
  0x17   :  { %v42_v4 = vstv %s267_s0  ;;  %v44_v5 = vstv %s388_s18  ;;  %s415_s30 = sld [smem:[#allocation2 + $0x5]]  ;;  %s417_s3 = sld [smem:[#allocation2 + $0x19]] }
  0x18   :  { %v34_v7 = vadd.f32 %v33_v3, %v32_v2  ;;  %v43_v8 = vmul.f32 %v42_v4, %v395_v0  ;;  %v53_v9 = vstv %s270_s20  ;;  %s421_s4 = sld [smem:[#allocation2 + $0x6]]  ;;  %v47_v11 = vstv %s390_s19  ;;  %s427_s5 = sld [smem:[#allocation2 + $0x2d]] }
  0x19   :  { %v54_v12 = vmul.f32 %v53_v9, %v395_v0  ;;  %v55_v13 = vstv %s397_s23  ;;  %s429_s6 = sld [smem:[#allocation2 + $0x1a]]  ;;  %s433_s7 = sld [smem:[#allocation2 + $0x7]]  ;;  %v58_v19 = vstv %s399_s24 }
  0x1a   :  { %v35_v14 = vmax.f32 %v34_v7, 0.0  ;;  %v45_v15 = vadd.f32 %v44_v5, %v43_v8  ;;  %v64_v16 = vstv %s401_s25  ;;  %v66_v17 = vstv %s403_s26  ;;  %s438_s8 = sld [smem:[#allocation2 + $0x2e]]  ;;  %s440_s9 = sld [smem:[#allocation2 + $0x1b]] }
  0x1b   :  { %v56_v18 = vadd.f32 %v55_v13, %v54_v12  ;;  %v65_v20 = vmul.f32 %v64_v16, %v395_v0  ;;  %v75_v21 = vstv %s407_s28  ;;  %s444_s10 = sld [smem:[#allocation2 + $0x8]]  ;;  %s446_s11 = sld [smem:[#allocation2 + $0x1c]]  ;;  %v69_v28 = vstv %s405_s27 }
  0x1c   :  { %v37_v22 = vmul.f32 %v36_v10, %v35_v14  ;;  %v46_v23 = vmax.f32 %v45_v15, 0.0  ;;  %v76_v24 = vmul.f32 %v75_v21, %v395_v0  ;;  %v77_v25 = vstv %s410_s1  ;;  %s450_s12 = sld [smem:[#allocation2 + $0x2f]]  ;;  %s453_s13 = sld [smem:[#allocation2 + $0x9]] }
  0x1d   :  { %v57_v26 = vmax.f32 %v56_v18, 0.0  ;;  %v67_v27 = vadd.f32 %v66_v17, %v65_v20  ;;  %v86_v29 = vstv %s415_s30  ;;  %s455_s14 = sld [smem:[#allocation2 + $0x1d]]  ;;  %v80_v36 = vstv %s412_s29  ;;  %s459_s15 = sld [smem:[#allocation2 + $0x30]] }
  0x1e   :  { %v38_v30 = vadd.f32 %v37_v22, %v27_v6  ;;  %v48_v31 = vmul.f32 %v47_v11, %v46_v23  ;;  %v78_v32 = vadd.f32 %v77_v25, %v76_v24  ;;  %v87_v33 = vmul.f32 %v86_v29, %v395_v0  ;;  %s462_s16 = sld [smem:[#allocation2 + $0xa]]  ;;  %s464_s17 = sld [smem:[#allocation2 + $0x1e]] }
  0x1f   :  { %v59_v34 = vmul.f32 %v58_v19, %v57_v26  ;;  %v68_v35 = vmax.f32 %v67_v27, 0.0  ;;  %v88_v37 = vstv %s417_s3  ;;  %v97_v41 = vstv %s421_s4  ;;  %s469_s0 = sld [smem:[#allocation2 + $0x31]]  ;;  %s472_s18 = sld [smem:[#allocation2 + $0xb]] }
  0x20   :  { %v49_v38 = vadd.f32 %v48_v31, %v38_v30  ;;  %v79_v39 = vmax.f32 %v78_v32, 0.0  ;;  %v89_v40 = vadd.f32 %v88_v37, %v87_v33  ;;  %v91_v43 = vstv %s427_s5  ;;  %s474_s19 = sld [smem:[#allocation2 + $0x1f]]  ;;  %s479_s20 = sld [smem:[#allocation2 + $0x32]] }
  0x21   :  { %v70_v42 = vmul.f32 %v69_v28, %v68_v35  ;;  %v98_v44 = vmul.f32 %v97_v41, %v395_v0  ;;  %v99_v45 = vstv %s429_s6  ;;  %v108_v49 = vstv %s433_s7  ;;  %s483_s21 = sld [smem:[#allocation2 + $0xc]]  ;;  %s485_s22 = sld [smem:[#allocation2 + $0x20]] }
  0x22   :  { %v60_v46 = vadd.f32 %v59_v34, %v49_v38  ;;  %v81_v47 = vmul.f32 %v80_v36, %v79_v39  ;;  %v90_v48 = vmax.f32 %v89_v40, 0.0  ;;  %v102_v51 = vstv %s438_s8  ;;  %s488_s23 = sld [smem:[#allocation2 + $0x33]]  ;;  %s493_s24 = sld [smem:[#allocation2 + $0xd]] }
  0x23   :  { %v100_v50 = vadd.f32 %v99_v45, %v98_v44  ;;  %v109_v52 = vmul.f32 %v108_v49, %v395_v0  ;;  %v110_v53 = vstv %s440_s9  ;;  %v119_v56 = vstv %s444_s10  ;;  %s495_s25 = sld [smem:[#allocation2 + $0x21]]  ;;  %s498_s26 = sld [smem:[#allocation2 + $0x34]] }
  0x24   :  { %v71_v54 = vadd.f32 %v70_v42, %v60_v46  ;;  %v92_v55 = vmul.f32 %v91_v43, %v90_v48  ;;  %v121_v57 = vstv %s446_s11  ;;  %v120_v60 = vmul.f32 %v119_v56, %v395_v0  ;;  %s503_s27 = sld [smem:[#allocation2 + $0xe]]  ;;  %s505_s28 = sld [smem:[#allocation2 + $0x22]] }
  0x25   :  { %v101_v58 = vmax.f32 %v100_v50, 0.0  ;;  %v111_v59 = vadd.f32 %v110_v53, %v109_v52  ;;  %v113_v62 = vstv %s450_s12  ;;  %v130_v63 = vstv %s453_s13  ;;  %s508_s1 = sld [smem:[#allocation2 + $0x35]]  ;;  %s513_s29 = sld [smem:[#allocation2 + $0xf]] }
  0x26   :  { %v82_v61 = vadd.f32 %v81_v47, %v71_v54  ;;  %v132_v1 = vstv %s455_s14  ;;  %v122_v4 = vadd.f32 %v121_v57, %v120_v60  ;;  %v131_v5 = vmul.f32 %v130_v63, %v395_v0  ;;  %s515_s30 = sld [smem:[#allocation2 + $0x23]]  ;;  %s518_s3 = sld [smem:[#allocation2 + $0x36]] }
  0x27   :  { %v103_v2 = vmul.f32 %v102_v51, %v101_v58  ;;  %v112_v3 = vmax.f32 %v111_v59, 0.0  ;;  %v124_v7 = vstv %s459_s15  ;;  %v141_v8 = vstv %s462_s16  ;;  %s523_s4 = sld [smem:[#allocation2 + $0x10]]  ;;  %s525_s5 = sld [smem:[#allocation2 + $0x24]] }
  0x28   :  { %v93_v6 = vadd.f32 %v92_v55, %v82_v61  ;;  %v143_v9 = vstv %s464_s17  ;;  %v123_v11 = vmax.f32 %v122_v4, 0.0  ;;  %v133_v12 = vadd.f32 %v132_v1, %v131_v5  ;;  %s528_s6 = sld [smem:[#allocation2 + $0x37]]  ;;  %s533_s7 = sld [smem:[#allocation2 + $0x11]] }
  0x29   :  { %v114_v10 = vmul.f32 %v113_v62, %v112_v3  ;;  %v142_v13 = vmul.f32 %v141_v8, %v395_v0  ;;  %v135_v15 = vstv %s469_s0  ;;  %v152_v16 = vstv %s472_s18  ;;  %s535_s8 = sld [smem:[#allocation2 + $0x25]]  ;;  %s538_s9 = sld [smem:[#allocation2 + $0x38]] }
  0x2a   :  { %v104_v14 = vadd.f32 %v103_v2, %v93_v6  ;;  %v154_v17 = vstv %s474_s19  ;;  %v125_v18 = vmul.f32 %v124_v7, %v123_v11  ;;  %v134_v19 = vmax.f32 %v133_v12, 0.0  ;;  %s543_s10 = sld [smem:[#allocation2 + $0x12]]  ;;  %s545_s11 = sld [smem:[#allocation2 + $0x26]] }
  0x2b   :  { %v144_v20 = vadd.f32 %v143_v9, %v142_v13  ;;  %v153_v21 = vmul.f32 %v152_v16, %v395_v0  ;;  %v146_v23 = vstv %s479_s20  ;;  %v163_v24 = vstv %s483_s21  ;;  %s548_s12 = sld [smem:[#allocation2 + $0x39]]  ;;  %s553_s13 = sld [smem:[#allocation2 + $0x13]] }
  0x2c   :  { %v115_v22 = vadd.f32 %v114_v10, %v104_v14  ;;  %v165_v25 = vstv %s485_s22  ;;  %v136_v26 = vmul.f32 %v135_v15, %v134_v19  ;;  %v164_v29 = vmul.f32 %v163_v24, %v395_v0  ;;  %s555_s14 = sld [smem:[#allocation2 + $0x27]]  ;;  %s561_s15 = sld [smem:[#allocation2 + $0x3a]] }
  0x2d   :  { %v145_v27 = vmax.f32 %v144_v20, 0.0  ;;  %v155_v28 = vadd.f32 %v154_v17, %v153_v21  ;;  %v157_v31 = vstv %s488_s23  ;;  %v174_v32 = vstv %s493_s24  ;;  %s567_s16 = sld [smem:[#allocation2 + $0x3b]]  ;;  %s365_s17 = smov [#allocation5]  }
  0x2e   :  { %v126_v30 = vadd.f32 %v125_v18, %v115_v22  ;;  %v176_v33 = vstv %s495_s25  ;;  %v166_v36 = vadd.f32 %v165_v25, %v164_v29  ;;  %v175_v37 = vmul.f32 %v174_v32, %v395_v0  ;;  %s255_s0 = sshll.u32 %s365_s17, 4  ;;  %s256_s0 = int_to_ptr.vmem [resolvable:$true] %s255_s0 }
  0x2f   :  { %v147_v34 = vmul.f32 %v146_v23, %v145_v27  ;;  %v156_v35 = vmax.f32 %v155_v28, 0.0  ;;  %v168_v39 = vstv %s498_s26  ;;  %v185_v40 = vstv %s503_s27  ;;  %s338_s18 = scalar_lea.vmem %s256_s0, 128  ;;  %p343_p6 = scmp.lt.s32.totalorder %s256_s0, %s256_s0 }
  0x30   :  { %v137_v38 = vadd.f32 %v136_v26, %v126_v30  ;;  %v187_v41 = vstv %s505_s28  ;;  %v167_v43 = vmax.f32 %v166_v36, 0.0  ;;  %v177_v44 = vadd.f32 %v176_v33, %v175_v37  ;;  %p339_p5 = scmp.ne.s32.totalorder %s256_s0, %s338_s18  ;;  %p344_p7 = scmp.lt.s32.totalorder %s338_s18, %s338_s18 }
  0x31   :  { %v158_v42 = vmul.f32 %v157_v31, %v156_v35  ;;  %v186_v45 = vmul.f32 %v185_v40, %v395_v0  ;;  %v179_v47 = vstv %s508_s1  ;;  %v196_v48 = vstv %s513_s29 }
  0x32   :  { %v148_v46 = vadd.f32 %v147_v34, %v137_v38  ;;  %v198_v49 = vstv %s515_s30  ;;  %v169_v50 = vmul.f32 %v168_v39, %v167_v43  ;;  %v178_v51 = vmax.f32 %v177_v44, 0.0  ;;  %p345_p8 = por %p344_p7, %p343_p6 }
  0x33   :  { %v188_v52 = vadd.f32 %v187_v41, %v186_v45  ;;  %v197_v53 = vmul.f32 %v196_v48, %v395_v0  ;;  %v190_v55 = vstv %s518_s3  ;;  %v207_v56 = vstv %s523_s4 }
  0x34   :  { %v159_v54 = vadd.f32 %v158_v42, %v148_v46  ;;  %v209_v57 = vstv %s525_s5  ;;  %v180_v58 = vmul.f32 %v179_v47, %v178_v51  ;;  %v208_v61 = vmul.f32 %v207_v56, %v395_v0  ;;  %p346_p9 = pnand %p345_p8, %p339_p5 }
  0x35   :  { %v189_v59 = vmax.f32 %v188_v52, 0.0  ;;  %v199_v60 = vadd.f32 %v198_v49, %v197_v53  ;;  %v201_v63 = vstv %s528_s6  ;;  %v218_v1 = vstv %s533_s7 }
  0x36   :  { %v170_v62 = vadd.f32 %v169_v50, %v159_v54  ;;  %v220_v2 = vstv %s535_s8  ;;  %v210_v5 = vadd.f32 %v209_v57, %v208_v61  ;;  %v219_v6 = vmul.f32 %v218_v1, %v395_v0 }
  0x37   :  { %v191_v3 = vmul.f32 %v190_v55, %v189_v59  ;;  %v200_v4 = vmax.f32 %v199_v60, 0.0  ;;  %v212_v8 = vstv %s538_s9  ;;  %v229_v9 = vstv %s543_s10 }
  0x38   :  { %v181_v7 = vadd.f32 %v180_v58, %v170_v62  ;;  %v231_v10 = vstv %s545_s11  ;;  %v211_v12 = vmax.f32 %v210_v5, 0.0  ;;  %v221_v13 = vadd.f32 %v220_v2, %v219_v6 }
  0x39   :  { %v202_v11 = vmul.f32 %v201_v63, %v200_v4  ;;  %v230_v14 = vmul.f32 %v229_v9, %v395_v0  ;;  %v223_v16 = vstv %s548_s12  ;;  %v240_v17 = vstv %s553_s13 }
  0x3a   :  { %v192_v15 = vadd.f32 %v191_v3, %v181_v7  ;;  %v242_v18 = vstv %s555_s14  ;;  %v213_v19 = vmul.f32 %v212_v8, %v211_v12  ;;  %v222_v20 = vmax.f32 %v221_v13, 0.0 }
  0x3b   :  { %v232_v21 = vadd.f32 %v231_v10, %v230_v14  ;;  %v241_v22 = vmul.f32 %v240_v17, %v395_v0  ;;  %v234_v24 = vstv %s561_s15  ;;  %v245_v29 = vstv %s567_s16 }
  0x3c   :  { %v203_v23 = vadd.f32 %v202_v11, %v192_v15  ;;  %v224_v25 = vmul.f32 %v223_v16, %v222_v20 }
  0x3d   :  { %v233_v26 = vmax.f32 %v232_v21, 0.0  ;;  %v243_v27 = vadd.f32 %v242_v18, %v241_v22 }
  0x3e   :  { %v214_v28 = vadd.f32 %v213_v19, %v203_v23 }
  0x3f   :  { %v235_v30 = vmul.f32 %v234_v24, %v233_v26  ;;  %v244_v31 = vmax.f32 %v243_v27, 0.0 }
  0x40   :  { %v225_v32 = vadd.f32 %v224_v25, %v214_v28 }
  0x41   :  { %v246_v33 = vmul.f32 %v245_v29, %v244_v31 }
  0x42   :  { %v236_v34 = vadd.f32 %v235_v30, %v225_v32 }
  0x44   :  { %v247_v35 = vadd.f32 %v246_v33, %v236_v34 }
  0x46   :  { %248 = vst [vmem:[#allocation5] sm:$0xff] %v247_v35 }
  0x47   :  { %349 = shalt.err (!%p346_p9)
}
  0x48   :  { %s350_s21 = scalar_lea.hbm %s594_s2, 128 }
  0x49   :  { %p351_p10 = scmp.ne.s32.totalorder %s594_s2, %s350_s21  ;;  %p354_p11 = scmp.lt.u32.totalorder %s350_s21, %s594_s2 }
  0x4b   :  { %p356_p12 = pnand %p354_p11, %p351_p10 }
  0x4d   :  { %359 = shalt.err (!%p356_p12)
}
  0x4e   :  { %258 = dma.vmem_to_hbm [thread:$0]  %s256_s0, 128, %s594_s2, [#allocation3]  }
  0x4f   :  { %362 = dma.done.wait [#allocation3], 128  }
  0x50   :  { %363 = vsyncadd [#allocation3], 4294967168 }
  0x51   :  { %262 = vsyncpa [#allocation3], 1 }
  0x52   :  { %263 = vsyncpa [#allocation4], 1 }

</bundles_post_ra>
